<compile_context>
chip_gen: v6e
topology: v6e:2x2x1
jax: 0.10.0
libtpu: 0.0.40
codegen_flags: <defaults>
</compile_context>

<pallas_src>
import functools

import numpy as np
import jax
import jax.numpy as jnp
from jax import lax
from jax.experimental import pallas as pl
from jax.experimental.pallas import tpu as pltpu


# --------------------------------------------------------------------------
# VMEM budgeting helpers
# --------------------------------------------------------------------------
@functools.lru_cache(maxsize=1)
def _vmem_budget_bytes():
    """~75% of per-core VMEM (v7x: 64 MiB, v5e/v6e: 128 MiB); 64 MiB fallback."""
    cap = 64 * 1024 * 1024
    try:
        cap = int(pltpu.get_tpu_info().vmem_capacity_bytes)
    except Exception:
        pass
    return int(cap * 3 // 4)


def _round_down8(x):
    return max((int(x) // 8) * 8, 8)


def _prefer_divisor(n, t, slack=0.75):
    """Largest multiple of 8 in [slack*t, t] dividing n, else t (ragged ok)."""
    lo = max(int(t * slack), 8)
    for d in range(t, lo - 1, -8):
        if n % d == 0:
            return d
    return t


def _pick_lstm_batch_tile(N, L, H, budget):
    if N < 16:
        return N
    # Per batch row, per grid step (double-buffered blocks):
    #   xproj bf16 [L,8H]; out_f/out_b f32 [L,H]; h0/c0/hn/cn f32 [2,H]; lens.
    per_row = 2 * (L * 8 * H * 2) + 2 * (2 * L * H * 4) + 2 * (4 * 2 * H * 4) + 16
    # Resident: whh_f/whh_b bf16 (double-buffered) + in-loop gate temporaries.
    fixed = 2 * 2 * (4 * H * H * 2) + 4 * (8 * H * 4) * 8
    bn = max(int((budget - fixed) // per_row), 8)
    # Keep >=2 grid steps so ("parallel",) shards across v7x's 2 TCs and the
    # next tile's xproj DMA overlaps the current tile's recurrence.
    half = ((N + 1) // 2 + 7) // 8 * 8
    bn = min(bn, half, N)
    bn = _round_down8(bn)
    # TODO(synk): when even bn=8 does not fit (huge L*H), stream the
    # recurrence over time chunks with h/c carried in VMEM scratch.
    return _prefer_divisor(N, bn)


def _pick_row_tile(M, Kin, Kout, out_bytes, budget):
    if M <= 16:
        return M
    per_row = 2 * Kin * 2 + 2 * Kout * out_bytes + Kout * 4
    fixed = 2 * Kin * Kout * 2 + 2 * Kout * 4
    t = max(int((budget - fixed) // max(per_row, 1)), 8)
    t = min(t, 4096, M)
    if t >= M:
        return M
    return _prefer_divisor(M, _round_down8(t))


def _pick_scatter_k_tile(K, M, F, budget):
    if K <= 16:
        return K
    fixed = 2 * (M * F * 2) + 4 * (M * 4)          # resident values + ids/mask
    per_k = 6 * M + 8 * F + 64                     # one-hot rows + out rows
    t = max(int((budget - fixed) // per_k), 8)
    t = min(t, K)
    if t >= K:
        return K
    return _round_down8(t)


# --------------------------------------------------------------------------
# Kernel 1: bidirectional LSTM recurrence (input projection already hoisted)
# --------------------------------------------------------------------------
def _bidir_lstm_kernel(len_ref, xproj_ref, h0_ref, c0_ref,
                       whh_f_ref, whh_b_ref,
                       outf_ref, outb_ref, hn_ref, cn_ref):
    # len_ref : [bn, 1] int32 valid lengths (packed-sequence semantics)
    # xproj   : [L, bn, 8H] bf16  -- x @ W_ih + b, gates (i,f,g,o) x {fwd,bwd}
    # h0/c0   : [2, bn, H] f32    whh_* : [H, 4H] bf16
    # outf/outb: [L, bn, H] f32 (per-direction, lane-dense writes)
    # hn/cn   : [2, bn, H] f32
    L = xproj_ref.shape[0]
    H = h0_ref.shape[-1]
    lens = len_ref[...]                                   # [bn, 1] int32
    whh_f = whh_f_ref[...]                                # bf16, cast outside
    whh_b = whh_b_ref[...]

    def cell(pre, h, c, whh):
        gates = pre.astype(jnp.float32) + jnp.dot(
            h.astype(jnp.bfloat16), whh, preferred_element_type=jnp.float32)
        # PyTorch gate order: i, f, g, o
        i_g = jax.nn.sigmoid(gates[:, 0 * H:1 * H])
        f_g = jax.nn.sigmoid(gates[:, 1 * H:2 * H])
        g_g = jnp.tanh(gates[:, 2 * H:3 * H])
        o_g = jax.nn.sigmoid(gates[:, 3 * H:4 * H])
        c_new = f_g * c + i_g * g_g
        h_new = o_g * jnp.tanh(c_new)
        return h_new, c_new

    def body(s, carry):
        hf, cf, hb, cb = carry
        tf = s
        tb = L - 1 - s
        # The two directions are independent: issue both small matmuls
        # back-to-back so each MXU drain hides under the other direction's
        # EUP/VPU gate work.
        hf_n, cf_n = cell(xproj_ref[tf, :, 0:4 * H], hf, cf, whh_f)
        hb_n, cb_n = cell(xproj_ref[tb, :, 4 * H:8 * H], hb, cb, whh_b)
        vf = lens > tf            # packed-seq: padded steps carry state
        vb = lens > tb            # bwd effectively starts at last valid step
        hf = jnp.where(vf, hf_n, hf)
        cf = jnp.where(vf, cf_n, cf)
        hb = jnp.where(vb, hb_n, hb)
        cb = jnp.where(vb, cb_n, cb)
        outf_ref[tf] = jnp.where(vf, hf_n, 0.0)
        outb_ref[tb] = jnp.where(vb, hb_n, 0.0)
        return hf, cf, hb, cb

    if L <= 16:
        unroll = L
    elif L % 4 == 0:
        unroll = 4
    elif L % 2 == 0:
        unroll = 2
    else:
        unroll = 1
    hf, cf, hb, cb = lax.fori_loop(
        0, L, body, (h0_ref[0], c0_ref[0], h0_ref[1], c0_ref[1]),
        unroll=unroll)
    hn_ref[0] = hf
    hn_ref[1] = hb
    cn_ref[0] = cf
    cn_ref[1] = cb


def bidir_lstm_layer(x_tm, lengths, h0, c0, lp):
    """x_tm: [L, N, Din] time-major. Returns (out [L, N, 2H], h_n, c_n)."""
    L, N, Din = x_tm.shape
    H = h0.shape[-1]
    budget = _vmem_budget_bytes()

    # Hoisted input projection: one lane-dense [L*N, Din] @ [Din, 8H] matmul
    # covering all timesteps, both directions, all 4 gates (+ bias). bf16 out.
    xproj = pallas_linear(x_tm.reshape(L * N, Din), lp['wih'], lp['b'],
                          out_dtype=jnp.bfloat16)
    xproj = xproj.reshape(L, N, 8 * H)
    # TODO(synk): fuse the input projection into the recurrence kernel per
    # time chunk to avoid the xproj HBM round trip entirely.

    whh_f = lp['whh_f'].astype(jnp.bfloat16)   # cast once, outside the kernel
    whh_b = lp['whh_b'].astype(jnp.bfloat16)

    bn = _pick_lstm_batch_tile(N, L, H, budget)
    grid = (pl.cdiv(N, bn),)

    flops = 2 * 2 * L * N * H * (4 * H) + 30 * L * N * H
    trans = 10 * L * N * H
    bytes_accessed = (L * N * 8 * H * 2 + 2 * L * N * H * 4
                      + 4 * 2 * N * H * 4 + grid[0] * 2 * 4 * H * H * 2 + 4 * N)

    out_f, out_b, hn, cn = pl.pallas_call(
        _bidir_lstm_kernel,
        grid=grid,
        out_shape=(jax.ShapeDtypeStruct((L, N, H), jnp.float32),
                   jax.ShapeDtypeStruct((L, N, H), jnp.float32),
                   jax.ShapeDtypeStruct((2, N, H), jnp.float32),
                   jax.ShapeDtypeStruct((2, N, H), jnp.float32)),
        in_specs=[
            pl.BlockSpec((bn, 1), lambda i: (i, 0)),             # lengths
            pl.BlockSpec((L, bn, 8 * H), lambda i: (0, i, 0)),   # xproj (bf16)
            pl.BlockSpec((2, bn, H), lambda i: (0, i, 0)),       # h0
            pl.BlockSpec((2, bn, H), lambda i: (0, i, 0)),       # c0
            pl.BlockSpec((H, 4 * H), lambda i: (0, 0)),          # whh_f (bf16)
            pl.BlockSpec((H, 4 * H), lambda i: (0, 0)),          # whh_b (bf16)
        ],
        out_specs=(
            pl.BlockSpec((L, bn, H), lambda i: (0, i, 0)),       # out fwd
            pl.BlockSpec((L, bn, H), lambda i: (0, i, 0)),       # out bwd
            pl.BlockSpec((2, bn, H), lambda i: (0, i, 0)),       # h_n
            pl.BlockSpec((2, bn, H), lambda i: (0, i, 0)),       # c_n
        ),
        compiler_params=pltpu.CompilerParams(
            dimension_semantics=("parallel",),
            vmem_limit_bytes=budget),
        cost_estimate=pl.CostEstimate(flops=int(flops),
                                      transcendentals=int(trans),
                                      bytes_accessed=int(bytes_accessed)),
    )(lengths.reshape(N, 1).astype(jnp.int32), xproj, h0, c0, whh_f, whh_b)

    # Single lane-dense stitch of the two directions (outside the recurrence).
    out = jnp.concatenate([out_f, out_b], axis=-1)
    return out, hn, cn


# --------------------------------------------------------------------------
# Kernel 2: row-tiled linear (+ optional activation), bf16 in / f32 acc
# --------------------------------------------------------------------------
def _linear_kernel(x_ref, w_ref, b_ref, o_ref, *, activation):
    y = jnp.dot(x_ref[...], w_ref[...],
                preferred_element_type=jnp.float32) + b_ref[...]
    if activation == 'relu':
        y = jnp.maximum(y, 0.0)
    elif activation == 'sigmoid':
        y = jax.nn.sigmoid(y)
    o_ref[...] = y.astype(o_ref.dtype)


def pallas_linear(x, w, b, activation='none', out_dtype=jnp.float32):
    M, Kin = x.shape
    Kout = w.shape[1]
    budget = _vmem_budget_bytes()
    x = x.astype(jnp.bfloat16)                 # halve x DMA / VMEM
    w = w.astype(jnp.bfloat16)                 # resident weight block in bf16
    b = b.reshape(1, Kout).astype(jnp.float32)
    out_bytes = np.dtype(out_dtype).itemsize
    tM = _pick_row_tile(M, Kin, Kout, out_bytes, budget)
    flops = 2 * M * Kin * Kout
    trans = M * Kout if activation == 'sigmoid' else 0
    bytes_accessed = M * Kin * 2 + Kin * Kout * 2 + M * Kout * out_bytes
    return pl.pallas_call(
        functools.partial(_linear_kernel, activation=activation),
        grid=(pl.cdiv(M, tM),),
        out_shape=jax.ShapeDtypeStruct((M, Kout), out_dtype),
        in_specs=[pl.BlockSpec((tM, Kin), lambda i: (i, 0)),
                  pl.BlockSpec((Kin, Kout), lambda i: (0, 0)),
                  pl.BlockSpec((1, Kout), lambda i: (0, 0))],
        out_specs=pl.BlockSpec((tM, Kout), lambda i: (i, 0)),
        compiler_params=pltpu.CompilerParams(
            dimension_semantics=("parallel",),
            vmem_limit_bytes=budget),
        cost_estimate=pl.CostEstimate(flops=int(flops),
                                      transcendentals=int(trans),
                                      bytes_accessed=int(bytes_accessed)),
    )(x, w, b)


# --------------------------------------------------------------------------
# Kernel 3: scatter reduce (mean/sum); one-hot built in-kernel, K-tiled
# --------------------------------------------------------------------------
def _scatter_kernel(ids_ref, mask_ref, x_ref, o_ref, *, reduce):
    M = x_ref.shape[0]
    tk = o_ref.shape[0]
    base = pl.program_id(0) * tk
    ids = ids_ref[...]                                     # [1, M] int32
    msk = mask_ref[...]                                    # [1, M] f32
    rows = base + lax.broadcasted_iota(jnp.int32, (tk, M), 0)
    onehot = jnp.where(rows == ids, msk, 0.0)              # [tk, M] f32
    sums = jnp.dot(onehot.astype(jnp.bfloat16), x_ref[...],
                   preferred_element_type=jnp.float32)     # [tk, F]
    if reduce == 'mean':
        counts = jnp.sum(onehot, axis=1, keepdims=True)    # XLU reduce
        sums = jnp.where(counts > 0, sums / jnp.maximum(counts, 1.0), 0.0)
    o_ref[...] = sums


def pallas_scatter(values, ids, mask, num_out, reduce='mean'):
    """scatter(values[mask], ids[mask], reduce) with output size num_out."""
    M, F = values.shape
    budget = _vmem_budget_bytes()
    ids_row = ids.reshape(1, M).astype(jnp.int32)
    mask_row = mask.reshape(1, M).astype(jnp.float32)
    values = values.astype(jnp.bfloat16)
    tk = _pick_scatter_k_tile(num_out, M, F, budget)
    # TODO(synk): for very large M also tile over M with an 'arbitrary'
    # accumulation axis (+ pl.when init) instead of keeping [M, F] resident.
    return pl.pallas_call(
        functools.partial(_scatter_kernel, reduce=reduce),
        grid=(pl.cdiv(num_out, tk),),
        out_shape=jax.ShapeDtypeStruct((num_out, F), jnp.float32),
        in_specs=[pl.BlockSpec((1, M), lambda i: (0, 0)),
                  pl.BlockSpec((1, M), lambda i: (0, 0)),
                  pl.BlockSpec((M, F), lambda i: (0, 0))],
        out_specs=pl.BlockSpec((tk, F), lambda i: (i, 0)),
        compiler_params=pltpu.CompilerParams(
            dimension_semantics=("parallel",),
            vmem_limit_bytes=budget),
        cost_estimate=pl.CostEstimate(
            flops=2 * num_out * M * F, transcendentals=0,
            bytes_accessed=M * F * 2 + num_out * F * 4 + M * 8),
    )(ids_row, mask_row, values)


# --------------------------------------------------------------------------
# Parameter init (deterministic, fused-gate layout)
# --------------------------------------------------------------------------
def init_params(key, pe_in, pe_out, hid, out_dim, num_layers, n_emb):
    ks = iter(jax.random.split(key, 8 + num_layers * 8))

    def u(k, shape, scale):
        return jax.random.uniform(k, shape, jnp.float32, -scale, scale)

    params = {'hid_dim': hid}
    emb = jax.random.normal(next(ks), (n_emb, hid), jnp.float32)
    params['embedding'] = emb.at[n_emb - 1].set(0.0)   # padding_idx = n_emb-1

    s = 1.0 / np.sqrt(pe_in)
    params['pe_w'] = u(next(ks), (pe_in, pe_out), s)
    params['pe_b'] = u(next(ks), (pe_out,), s)

    lstm = []
    for l in range(num_layers):
        din = hid + pe_out if l == 0 else 2 * hid
        sh = 1.0 / np.sqrt(hid)
        layer = {
            # input weights: both directions + 4 gates (i,f,g,o) fused
            'wih': u(next(ks), (din, 8 * hid), sh),        # [Din, 8H]
            'b': u(next(ks), (8 * hid,), sh),              # b_ih + b_hh
            # recurrent weights, gate-fused per direction
            'whh_f': u(next(ks), (hid, 4 * hid), sh),      # [H, 4H]
            'whh_b': u(next(ks), (hid, 4 * hid), sh),
        }
        lstm.append(layer)
    params['lstm'] = lstm

    s1 = 1.0 / np.sqrt(2 * hid)
    params['ro1_w'] = u(next(ks), (2 * hid, 2 * hid), s1)
    params['ro1_b'] = u(next(ks), (2 * hid,), s1)
    params['ro2_w'] = u(next(ks), (2 * hid, out_dim), s1)
    params['ro2_b'] = u(next(ks), (out_dim,), s1)
    return params


# --------------------------------------------------------------------------
# Forward pass (glue in plain JAX / numpy for index bookkeeping)
# --------------------------------------------------------------------------
def rsnn_lstm_forward(params, walk_emb, walk_ids, walk_pe, lengths,
                      num_layers, reduce='mean'):
    # --- host-side index preprocessing (mirrors the Python loops + .cpu()) ---
    walk_ids_np = np.asarray(walk_ids)
    lengths_np = np.asarray(lengths)
    B, W, _ = walk_ids_np.shape
    N = B * W
    graph_ns = [int(walk_ids_np[i].max()) for i in range(B)]
    L = int(lengths_np.max())
    walk_ids_np = walk_ids_np[:, :, :L]
    offsets = np.zeros((B, 1, 1), dtype=np.int64)
    for i in range(1, B):
        offsets[i] = sum(graph_ns[:i]) + i
    ids_bf = walk_ids_np.reshape(N, L)                       # batch-first [N,L]
    ids_proc_bf = (walk_ids_np + offsets).reshape(N, L)
    mask_bf = ids_bf != -1
    num_nodes = sum(graph_ns) + B
    safe_ids_bf = np.where(mask_bf, ids_proc_bf, 0)

    # Reorder once to TIME-MAJOR flat order (t*N + n): activations stay
    # [L, N, D] across layers, so no per-layer transposes are needed.
    mask_tm = jnp.asarray(mask_bf.T.reshape(-1))
    node_ids_tm = jnp.asarray(safe_ids_bf.T.reshape(-1).astype(np.int32))
    lengths_j = jnp.asarray(lengths_np.astype(np.int32))

    # --- embedding lookup + positional-encoding linear (time-major) ---
    walk_emb_np = np.asarray(walk_emb)[:, :L]
    emb_tm = jnp.take(params['embedding'], jnp.asarray(walk_emb_np.T), axis=0)
    pe_in = walk_pe.shape[-1]
    pe_tm_in = jnp.transpose(jnp.asarray(walk_pe)[:, :L, :], (1, 0, 2))
    pe_tm = pallas_linear(pe_tm_in.reshape(L * N, pe_in),
                          params['pe_w'], params['pe_b']).reshape(L, N, -1)
    x = jnp.concatenate([emb_tm, pe_tm], axis=-1)            # [L, N, H+pe_out]

    hid = params['hid_dim']
    h_carry = (jnp.zeros((2, N, hid), jnp.float32),
               jnp.zeros((2, N, hid), jnp.float32))
    node_agg = None
    for l in range(num_layers):
        out_tm, hn, cn = bidir_lstm_layer(x, lengths_j, h_carry[0], h_carry[1],
                                          params['lstm'][l])
        h_carry = (hn, cn)
        x_flat = out_tm.reshape(L * N, 2 * hid)               # time-major flat
        node_agg = pallas_scatter(x_flat, node_ids_tm, mask_tm,
                                  num_nodes, 'mean')
        if l != num_layers - 1:
            # TODO(synk): fuse this gather into the next layer's input
            # projection via scalar-prefetch / pl.Element row gather.
            gathered = jnp.take(node_agg, node_ids_tm, axis=0)   # [L*N, 2H]
            x_flat = jnp.where(mask_tm[:, None], gathered, x_flat)
            x = x_flat.reshape(L, N, 2 * hid)

    # --- graph-level readout ---
    graph_ids = np.concatenate(
        [np.full((graph_ns[i] + 1,), i, dtype=np.int32) for i in range(B)])
    xg = pallas_scatter(node_agg, jnp.asarray(graph_ids),
                        jnp.ones((num_nodes,), jnp.float32), B, reduce)
    xg = pallas_linear(xg, params['ro1_w'], params['ro1_b'], activation='relu')
    xg = pallas_linear(xg, params['ro2_w'], params['ro2_b'],
                       activation='sigmoid')
    return xg


# --------------------------------------------------------------------------
if __name__ == "__main__":
    B, W, L = 2, 3, 8                 # 2 graphs, 3 walks each, walk length 8
    pe_in_dim, pe_out_dim, hid_dim, out_dim = 6, 8, 16, 4
    num_layers, n_emb, reduce = 2, 10, 'mean'
    N = B * W

    key = jax.random.PRNGKey(0)
    k_len, k_ids, k_emb, k_pe, k_par = jax.random.split(key, 5)

    lengths = jax.random.randint(k_len, (N,), 4, L + 1)
    lengths = lengths.at[0].set(L)    # make sure max(lengths) == L
    lengths_np = np.array(lengths)    # writable host copy

    graph_num_nodes = [5, 4]          # per-graph node-id ranges
    walk_ids = np.full((B, W, L), -1, dtype=np.int64)
    node_key = k_ids
    for b in range(B):
        for w in range(W):
            ln = int(lengths_np[b * W + w])
            node_key, sub = jax.random.split(node_key)
            ids = jax.random.randint(sub, (ln,), 0, graph_num_nodes[b])
            walk_ids[b, w, :ln] = np.asarray(ids)
    walk_ids[0, 0, 0] = graph_num_nodes[0] - 1   # max id present in each graph
    walk_ids[1, 0, 0] = graph_num_nodes[1] - 1

    walk_emb = np.array(jax.random.randint(k_emb, (N, L), 0, n_emb - 1))
    pad_pos = np.arange(L)[None, :] >= lengths_np[:, None]
    walk_emb = np.where(pad_pos, n_emb - 1, walk_emb)        # padding index
    walk_pe = jax.random.normal(k_pe, (N, L, pe_in_dim), dtype=jnp.float32)

    params = init_params(k_par, pe_in_dim, pe_out_dim, hid_dim, out_dim,
                         num_layers, n_emb)

    out = rsnn_lstm_forward(params, walk_emb, walk_ids, walk_pe, lengths_np,
                            num_layers, reduce)
    out = jax.block_until_ready(out)
    assert out.shape == (B, out_dim), out.shape
    assert bool(jnp.all(jnp.isfinite(out)))
    assert bool(jnp.all((out >= 0.0) & (out <= 1.0)))        # sigmoid output
    print("KERNEL_OK")
</pallas_src>

<mosaic_0001>
module attributes {stable_mosaic.version = 11 : i64} {
  func.func @_linear_kernel(%arg0: i32, %arg1: memref<48x6xbf16, #tpu.memory_space<vmem>>, %arg2: memref<6x8xbf16, #tpu.memory_space<vmem>>, %arg3: memref<1x8xf32, #tpu.memory_space<vmem>>, %arg4: memref<48x8xf32, #tpu.memory_space<vmem>>) attributes {dimension_semantics = [#tpu.dimension_semantics<parallel>], iteration_bounds = array<i64: 1>, scalar_prefetch = 0 : i64, scratch_operands = 0 : i64, tpu.core_type = #tpu.core_type<tc>, window_params = [{transform_indices = @transform_0, window_bounds = array<i64: 48, 6>}, {pipeline_mode = #tpu.pipeline_mode<synchronous>, transform_indices = @transform_1, window_bounds = array<i64: 6, 8>}, {pipeline_mode = #tpu.pipeline_mode<synchronous>, transform_indices = @transform_2, window_bounds = array<i64: 1, 8>}, {transform_indices = @transform_3, window_bounds = array<i64: 48, 8>}]} {
    %c0 = arith.constant 0 : index
    %c0_0 = arith.constant 0 : index
    %0 = vector.load %arg1[%c0, %c0_0] : memref<48x6xbf16, #tpu.memory_space<vmem>>, vector<48x6xbf16>
    %c0_1 = arith.constant 0 : index
    %c0_2 = arith.constant 0 : index
    %1 = vector.load %arg2[%c0_1, %c0_2] : memref<6x8xbf16, #tpu.memory_space<vmem>>, vector<6x8xbf16>
    %cst = arith.constant dense<0.000000e+00> : vector<48x8xf32>
    %2 = tpu.matmul %0, %1, %cst {dimension_numbers = #tpu.dot_dimension_numbers<[1], [0], [0], [1], [0, 0, 1, 1], [], []>} : vector<48x6xbf16>, vector<6x8xbf16>, vector<48x8xf32> -> vector<48x8xf32>
    %c0_3 = arith.constant 0 : index
    %c0_4 = arith.constant 0 : index
    %3 = vector.load %arg3[%c0_3, %c0_4] : memref<1x8xf32, #tpu.memory_space<vmem>>, vector<1x8xf32>
    %4 = vector.broadcast %3 : vector<1x8xf32> to vector<48x8xf32>
    %5 = arith.addf %2, %4 : vector<48x8xf32>
    %c0_5 = arith.constant 0 : index
    %c0_6 = arith.constant 0 : index
    %6 = vector.load %arg4[%c0_5, %c0_6] : memref<48x8xf32, #tpu.memory_space<vmem>>, vector<48x8xf32>
    tpu.vector_store %arg4[%c0_5, %c0_6], %5 {strides = array<i32>} : memref<48x8xf32, #tpu.memory_space<vmem>>, vector<48x8xf32>,
    return
  }
  func.func @transform_0(%arg0: i32) -> (i32, i32) {
    %c0_i32 = arith.constant 0 : i32
    %c0_i32_0 = arith.constant 0 : i32
    return %arg0, %c0_i32 : i32, i32
  }
  func.func @transform_1(%arg0: i32) -> (i32, i32) {
    %c0_i32 = arith.constant 0 : i32
    %c0_i32_0 = arith.constant 0 : i32
    %c0_i32_1 = arith.constant 0 : i32
    return %c0_i32, %c0_i32_0 : i32, i32
  }
  func.func @transform_2(%arg0: i32) -> (i32, i32) {
    %c0_i32 = arith.constant 0 : i32
    %c0_i32_0 = arith.constant 0 : i32
    %c0_i32_1 = arith.constant 0 : i32
    return %c0_i32, %c0_i32_0 : i32, i32
  }
  func.func @transform_3(%arg0: i32) -> (i32, i32) {
    %c0_i32 = arith.constant 0 : i32
    %c0_i32_0 = arith.constant 0 : i32
    return %arg0, %c0_i32 : i32, i32
  }
}

</mosaic_0001>

<bundles_post_ra>
// kernel: tpu_custom_call.1
= control target key start
LH: loop header
LB: loop body
LE: loop exit
PB: predicated region body
PF: predicated region fallthrough
CT: control target
= control target key end

     0   :  { %vm54_vm0 = vcmask 1042432   ;;  %v158_v0 = vmov 0.0   ;;  %vm159_vm1 = vmmov 0   ;;  %vm44_vm2 = vcmask 48128   ;;  %s219_s1 = inlined_call_operand.vmem [shape: bf16[6,8], index: 1, kind: input, shape index: {}]   ;;  %s220_s0 = inlined_call_operand.vmem [shape: bf16[48,6], index: 0, kind: input, shape index: {}]   ;;  %s221_s2 = inlined_call_operand.vmem [shape: f32[1,8], index: 2, kind: input, shape index: {}]   ;;  %s222_s3 = inlined_call_operand.vmem [shape: f32[48,8], index: 3, kind: output, shape index: {}]  }
   0x1   :  { %151 = vmatprep.subr.bf16.mxu1 %v158_v0  ;;  %v21_v1 = vld [vmem:[%s219_s1] sm:$0x7]  ;;  %137 = vmatprep.subr.bf16.mxu0 %v158_v0  ;;  %v155_v3 = vld [vmem:[%s220_s0 + $0x8] sm:$0xff]   ;;  %v157_v5 = vld [vmem:[%s220_s0 + $0x10] sm:$0xff]   ;;  %vm115_vm3 = vcmask 64512  }
   0x2   :  { %v56_v2 = vsel %vm54_vm0, %v21_v1, 0  ;;  %143 = vmatprep.mubr.msk.bf16.mxu1 %vm159_vm1, %v158_v0  ;;  %139 = vmatprep.mubr.msk.bf16.mxu0 %vm159_vm1, %v158_v0  ;;  %v156_v4 = vld [vmem:[%s220_s0] sm:$0xff]  }
   0x3   :  { %152 = vmatpush3.bf16.msra.mxu1 %v56_v2  ;;  %138 = vmatpush3.bf16.msra.mxu0 %v56_v2  ;;  %v126_v6 = vld [vmem:[%s221_s2] ss:$0 sm:$0xff] }
   0x6   :  { %144 = vmatmul.mubr.msk.bf16.vlgmr.msra.gmra.mxu1 %vm44_vm2, %v155_v3  ;;  %140 = vmatmul.mubr.msk.bf16.vlgmr.msra.gmra.mxu0 %vm44_vm2, %v156_v4 }
   0x7   :  { %147 = vmatprep.mubr.msk.bf16.mxu1 %vm159_vm1, %v158_v0 }
   0xe   :  { %148 = vmatmul.mubr.msk.bf16.gmra.mxu1 %vm44_vm2, %v157_v5 }
  0xc6   :  { %v100_v7 = vpop.f32.mrf.mxu1  ;;  %v92_v8 = vpop.f32.mrf.mxu0 }
  0xc7   :  { %v101_v9 = vadd.f32 %v126_v6, %v100_v7  ;;  %v93_v10 = vadd.f32 %v126_v6, %v92_v8 }
  0xc8   :  { %v145_v11 = vpop.f32.mrf.mxu1  ;;  %v141_v12 = vpop.f32.mrf.mxu0 }
  0xc9   :  { %118 = vst.msk [vmem:[%s222_s3 + $0x10] sm:$0xff] %vm115_vm3, %v101_v9  ;;  %116 = vst.msk [vmem:[%s222_s3] sm:$0xff] %vm115_vm3, %v93_v10 }
  0xca   :  { %v103_v13 = vpop.f32.mrf.mxu1  ;;  %v95_v14 = vpop.f32.mrf.mxu0 }
  0xcb   :  { %v104_v15 = vadd.f32 %v126_v6, %v103_v13  ;;  %v96_v16 = vadd.f32 %v126_v6, %v95_v14 }
  0xcc   :  { %v146_v17 = vpop.f32.mrf.mxu1  ;;  %v142_v18 = vpop.f32.mrf.mxu0 }
  0xcd   :  { %119 = vst.msk [vmem:[%s222_s3 + $0x18] sm:$0xff] %vm115_vm3, %v104_v15  ;;  %117 = vst.msk [vmem:[%s222_s3 + $0x8] sm:$0xff] %vm115_vm3, %v96_v16 }
  0xce   :  { %v108_v19 = vpop.f32.mrf.mxu1 }
  0xcf   :  { %v109_v20 = vadd.f32 %v126_v6, %v108_v19 }
  0xd0   :  { %v149_v21 = vpop.f32.mrf.mxu1 }
  0xd1   :  { %120 = vst.msk [vmem:[%s222_s3 + $0x20] sm:$0xff] %vm115_vm3, %v109_v20 }
  0xd2   :  { %v111_v22 = vpop.f32.mrf.mxu1 }
  0xd3   :  { %v112_v23 = vadd.f32 %v126_v6, %v111_v22 }
  0xd4   :  { %v150_v24 = vpop.f32.mrf.mxu1 }
  0xd5   :  { %121 = vst.msk [vmem:[%s222_s3 + $0x28] sm:$0xff] %vm115_vm3, %v112_v23 }

</bundles_post_ra>
